<compile_context>
chip_gen: v7x
topology: tpu7x:2x2x1
jax: 0.10.0
libtpu: 0.0.40
codegen_flags: <defaults>
</compile_context>

<pallas_src>
import functools

import numpy as np
import jax
import jax.numpy as jnp
from jax import lax
from jax.experimental import pallas as pl
from jax.experimental.pallas import tpu as pltpu


# ----------------------------------------------------------------------------
# Parameter construction (deterministic; spectral-radius scaling done host-side)
# ----------------------------------------------------------------------------
def make_params(key, n_inp, n_hid, gamma_range, eps_range, rho, input_scaling):
    k_h2h, k_x2h, k_gamma, k_eps = jax.random.split(key, 4)

    # topology='full': uniform(-1, 1), then rescale spectral radius to rho.
    h2h = jax.random.uniform(k_h2h, (n_hid, n_hid), minval=-1.0, maxval=1.0,
                             dtype=jnp.float32)
    eig = np.linalg.eigvals(np.asarray(h2h, dtype=np.float64))
    sr = np.max(np.abs(eig))
    h2h = (h2h * (rho / sr)).astype(jnp.float32)

    # x2h in (0, 1) * input_scaling, as in the module.
    x2h = (jax.random.uniform(k_x2h, (n_inp, n_hid), dtype=jnp.float32)
           * input_scaling)

    gamma = (jax.random.uniform(k_gamma, (n_hid,), dtype=jnp.float32)
             * (gamma_range[1] - gamma_range[0]) + gamma_range[0])
    epsilon = (jax.random.uniform(k_eps, (n_hid,), dtype=jnp.float32)
               * (eps_range[1] - eps_range[0]) + eps_range[0])
    return h2h, x2h, gamma, epsilon


# ----------------------------------------------------------------------------
# Pallas kernel: one grid step == one chunk of time steps (sequential recurrence)
# ----------------------------------------------------------------------------
def liquid_ron_kernel(xin_ref, h2h_ref, gdt_ref, edt_ref,   # inputs
                      out_ref,                              # fused output
                      hy_s, hz_s, u_s,                      # VMEM state scratch
                      *, dt, threshold, leak, reset):
    c = pl.program_id(0)

    @pl.when(c == 0)
    def _():
        hy_s[...] = jnp.zeros_like(hy_s)
        hz_s[...] = jnp.zeros_like(hz_s)
        u_s[...] = jnp.zeros_like(u_s)

    t_chunk = xin_ref.shape[0]
    Bp, Hp = hy_s.shape

    # Hoisted loads / broadcasts (JAX does not CSE broadcast_in_dim per iter).
    h2h = h2h_ref[...]                                    # (Hp, Hp), resident
    gdt = jnp.broadcast_to(gdt_ref[...], (Bp, Hp))        # dt * gamma
    edt = jnp.broadcast_to(edt_ref[...], (Bp, Hp))        # dt * epsilon
    keep = jnp.float32(1.0 - leak)                        # 1 - R*C*dt
    a = jnp.float32(leak)                                 # R*C*dt
    dt_f = jnp.float32(dt)
    thr = jnp.float32(threshold)
    rst = jnp.float32(reset)

    def step(i, carry):
        hy, hz, u = carry
        x_t = xin_ref[i]                                  # (Bp, Hp) pre-projected input

        # --- spiking_layer ---
        mask = u > thr
        spike = mask.astype(jnp.float32)
        u = jnp.where(mask, rst, u)
        # u += (-u + hy@h2h + x@x2h) * R*C*dt  ==  u*(1-a) + a*(hy@h2h + xin)
        u = u * keep + a * (jnp.dot(hy, h2h, preferred_element_type=jnp.float32)
                            + x_t)

        # --- oscillator cell update ---
        hz = hz + dt_f * u - gdt * hy - edt * hz
        hy = hy + dt_f * hz

        # One lane-dense store per step: [hy | hz | u | spike] along lanes.
        out_ref[i] = jnp.concatenate([hy, hz, u, spike], axis=-1)
        return hy, hz, u

    hy, hz, u = lax.fori_loop(0, t_chunk, step,
                              (hy_s[...], hz_s[...], u_s[...]),
                              unroll=True)

    hy_s[...] = hy
    hz_s[...] = hz
    u_s[...] = u


def liquid_ron_forward(x_btf, h2h, x2h, gamma, epsilon, *,
                       dt, threshold=0.008, R=5.0, C=0.005, reset=0.0,
                       t_chunk=8):
    """x_btf: (batch, time, n_inp) -> four arrays of shape (batch, time, n_hid)."""
    B, T, n_inp = x_btf.shape
    n_hid = h2h.shape[0]
    t_chunk = max(1, min(int(t_chunk), T))

    # --- hoisted input projection: one big matmul over all T*B rows ---------
    xin = jnp.einsum('bti,ih->bth', x_btf.astype(jnp.float32),
                     x2h.astype(jnp.float32),
                     preferred_element_type=jnp.float32)          # (B, T, n_hid)
    xin = jnp.transpose(xin, (1, 0, 2))                           # (T, B, n_hid)

    # --- pad to TPU-friendly tiles: batch -> x8 sublanes, hidden -> x128 lanes
    Bp = max(8, ((B + 7) // 8) * 8)
    Hp = max(128, ((n_hid + 127) // 128) * 128)
    Tp = ((T + t_chunk - 1) // t_chunk) * t_chunk
    n_chunks = Tp // t_chunk

    xin_p = jnp.zeros((Tp, Bp, Hp), jnp.float32).at[:T, :B, :n_hid].set(xin)
    h2h_p = jnp.zeros((Hp, Hp), jnp.float32).at[:n_hid, :n_hid].set(
        h2h.astype(jnp.float32))
    gdt = jnp.zeros((1, Hp), jnp.float32).at[0, :n_hid].set(
        jnp.float32(dt) * gamma.astype(jnp.float32))
    edt = jnp.zeros((1, Hp), jnp.float32).at[0, :n_hid].set(
        jnp.float32(dt) * epsilon.astype(jnp.float32))

    leak = float(R) * float(C) * float(dt)

    kern = functools.partial(liquid_ron_kernel, dt=float(dt),
                             threshold=float(threshold), leak=leak,
                             reset=float(reset))

    # Explicit VMEM budget from actual block sizes (double-buffered IO blocks
    # + resident weights + scratch) with headroom; matters on v7x (64 MiB).
    io_block_bytes = 4 * (t_chunk * Bp * Hp + t_chunk * Bp * 4 * Hp)
    weight_bytes = 4 * (Hp * Hp + 2 * Hp)
    scratch_bytes = 4 * 3 * Bp * Hp
    vmem_limit = min(128 << 20,
                     max(16 << 20,
                         2 * io_block_bytes + 2 * weight_bytes
                         + scratch_bytes + (2 << 20)))

    out = pl.pallas_call(
        kern,
        out_shape=jax.ShapeDtypeStruct((Tp, Bp, 4 * Hp), jnp.float32),
        grid_spec=pltpu.PrefetchScalarGridSpec(
            num_scalar_prefetch=0,
            grid=(n_chunks,),
            in_specs=[
                pl.BlockSpec((t_chunk, Bp, Hp), lambda c: (c, 0, 0)),  # xin
                pl.BlockSpec((Hp, Hp), lambda c: (0, 0)),              # h2h
                pl.BlockSpec((1, Hp), lambda c: (0, 0)),               # dt*gamma
                pl.BlockSpec((1, Hp), lambda c: (0, 0)),               # dt*eps
            ],
            out_specs=pl.BlockSpec((t_chunk, Bp, 4 * Hp), lambda c: (c, 0, 0)),
            scratch_shapes=[
                pltpu.VMEM((Bp, Hp), jnp.float32),   # hy
                pltpu.VMEM((Bp, Hp), jnp.float32),   # hz
                pltpu.VMEM((Bp, Hp), jnp.float32),   # u
            ],
        ),
        compiler_params=pltpu.CompilerParams(
            dimension_semantics=("arbitrary",),      # sequential recurrence
            vmem_limit_bytes=int(vmem_limit)),
    )(xin_p, h2h_p, gdt, edt)

    # Back to (batch, time, ...) and split the fused lane-dense output.
    out = jnp.transpose(out, (1, 0, 2))[:B, :T]      # (B, T, 4*Hp)
    hy = out[:, :, 0 * Hp:0 * Hp + n_hid]
    hz = out[:, :, 1 * Hp:1 * Hp + n_hid]
    u = out[:, :, 2 * Hp:2 * Hp + n_hid]
    spk = out[:, :, 3 * Hp:3 * Hp + n_hid]
    return hy, hz, u, spk


# ----------------------------------------------------------------------------
# Pure-JAX reference (for verification only)
# ----------------------------------------------------------------------------
def liquid_ron_reference(x_btf, h2h, x2h, gamma, epsilon, *,
                         dt, threshold=0.008, R=5.0, C=0.005, reset=0.0):
    B, T, _ = x_btf.shape
    n_hid = h2h.shape[0]
    hy = jnp.zeros((B, n_hid), jnp.float32)
    hz = jnp.zeros((B, n_hid), jnp.float32)
    u = jnp.zeros((B, n_hid), jnp.float32)

    def step(carry, x_t):
        hy, hz, u = carry
        spike = (u > threshold).astype(jnp.float32)
        u = jnp.where(spike == 1.0, reset, u)
        u_dot = -u + (hy @ h2h + x_t @ x2h)
        u = u + u_dot * (R * C) * dt
        hz = hz + dt * (u - gamma * hy - epsilon * hz)
        hy = hy + dt * hz
        return (hy, hz, u), (hy, hz, u, spike)

    _, (hys, hzs, us, spks) = jax.lax.scan(
        step, (hy, hz, u), jnp.transpose(x_btf, (1, 0, 2)))
    tr = lambda a: jnp.transpose(a, (1, 0, 2))
    return tr(hys), tr(hzs), tr(us), tr(spks)


if __name__ == "__main__":
    B, T, n_inp, n_hid = 2, 8, 4, 32
    dt = 0.042
    rho = 0.99
    input_scaling = 1.0
    gamma_range = (2.7, 4.7)
    eps_range = (4.7, 6.7)

    key = jax.random.PRNGKey(0)
    k_param, k_x = jax.random.split(key)
    h2h, x2h, gamma, epsilon = make_params(
        k_param, n_inp, n_hid, gamma_range, eps_range, rho, input_scaling)

    x = jax.random.normal(k_x, (B, T, n_inp), dtype=jnp.float32)

    # t_chunk=4 -> grid of 2 chunks, exercising state carry across grid steps.
    hy, hz, u, spk = liquid_ron_forward(x, h2h, x2h, gamma, epsilon,
                                        dt=dt, t_chunk=4)
    jax.block_until_ready((hy, hz, u, spk))

    hy_r, hz_r, u_r, spk_r = liquid_ron_reference(
        x, h2h, x2h, gamma, epsilon, dt=dt)
    np.testing.assert_allclose(np.asarray(hy), np.asarray(hy_r), rtol=1e-4, atol=1e-5)
    np.testing.assert_allclose(np.asarray(hz), np.asarray(hz_r), rtol=1e-4, atol=1e-5)
    np.testing.assert_allclose(np.asarray(u), np.asarray(u_r), rtol=1e-4, atol=1e-5)
    np.testing.assert_allclose(np.asarray(spk), np.asarray(spk_r), rtol=0, atol=0)

    print("KERNEL_OK")
</pallas_src>

<mosaic_0001>
module attributes {stable_mosaic.version = 11 : i64} {
  func.func @liquid_ron_kernel(%arg0: i32, %arg1: memref<4x8x128xf32, #tpu.memory_space<vmem>>, %arg2: memref<128x128xf32, #tpu.memory_space<vmem>>, %arg3: memref<1x128xf32, #tpu.memory_space<vmem>>, %arg4: memref<1x128xf32, #tpu.memory_space<vmem>>, %arg5: memref<4x8x512xf32, #tpu.memory_space<vmem>>, %arg6: memref<8x128xf32, #tpu.memory_space<vmem>>, %arg7: memref<8x128xf32, #tpu.memory_space<vmem>>, %arg8: memref<8x128xf32, #tpu.memory_space<vmem>>) attributes {dimension_semantics = [#tpu.dimension_semantics<arbitrary>], iteration_bounds = array<i64: 2>, scalar_prefetch = 0 : i64, scratch_operands = 3 : i64, tpu.core_type = #tpu.core_type<tc>, window_params = [{transform_indices = @transform_0, window_bounds = array<i64: 4, 8, 128>}, {pipeline_mode = #tpu.pipeline_mode<synchronous>, transform_indices = @transform_1, window_bounds = array<i64: 128, 128>}, {pipeline_mode = #tpu.pipeline_mode<synchronous>, transform_indices = @transform_2, window_bounds = array<i64: 1, 128>}, {pipeline_mode = #tpu.pipeline_mode<synchronous>, transform_indices = @transform_3, window_bounds = array<i64: 1, 128>}, {transform_indices = @transform_4, window_bounds = array<i64: 4, 8, 512>}]} {
    %c0_i32 = arith.constant 0 : i32
    %0 = arith.cmpi eq, %arg0, %c0_i32 : i32
    %1 = arith.extui %0 : i1 to i32
    %c0_i32_0 = arith.constant 0 : i32
    %2 = arith.cmpi ne, %1, %c0_i32_0 : i32
    scf.if %2 {
      %cst_43 = arith.constant 0.000000e+00 : f32
      %140 = vector.broadcast %cst_43 : f32 to vector<8x128xf32>
      %c0_44 = arith.constant 0 : index
      %c0_45 = arith.constant 0 : index
      %141 = vector.load %arg6[%c0_44, %c0_45] : memref<8x128xf32, #tpu.memory_space<vmem>>, vector<8x128xf32>
      tpu.vector_store %arg6[%c0_44, %c0_45], %140 {strides = array<i32>} : memref<8x128xf32, #tpu.memory_space<vmem>>, vector<8x128xf32>,
      %cst_46 = arith.constant 0.000000e+00 : f32
      %142 = vector.broadcast %cst_46 : f32 to vector<8x128xf32>
      %c0_47 = arith.constant 0 : index
      %c0_48 = arith.constant 0 : index
      %143 = vector.load %arg7[%c0_47, %c0_48] : memref<8x128xf32, #tpu.memory_space<vmem>>, vector<8x128xf32>
      tpu.vector_store %arg7[%c0_47, %c0_48], %142 {strides = array<i32>} : memref<8x128xf32, #tpu.memory_space<vmem>>, vector<8x128xf32>,
      %cst_49 = arith.constant 0.000000e+00 : f32
      %144 = vector.broadcast %cst_49 : f32 to vector<8x128xf32>
      %c0_50 = arith.constant 0 : index
      %c0_51 = arith.constant 0 : index
      %145 = vector.load %arg8[%c0_50, %c0_51] : memref<8x128xf32, #tpu.memory_space<vmem>>, vector<8x128xf32>
      tpu.vector_store %arg8[%c0_50, %c0_51], %144 {strides = array<i32>} : memref<8x128xf32, #tpu.memory_space<vmem>>, vector<8x128xf32>,
    } else {
    }
    %c0 = arith.constant 0 : index
    %c0_1 = arith.constant 0 : index
    %3 = vector.load %arg2[%c0, %c0_1] : memref<128x128xf32, #tpu.memory_space<vmem>>, vector<128x128xf32>
    %c0_2 = arith.constant 0 : index
    %c0_3 = arith.constant 0 : index
    %4 = vector.load %arg3[%c0_2, %c0_3] : memref<1x128xf32, #tpu.memory_space<vmem>>, vector<1x128xf32>
    %5 = vector.shape_cast %4 : vector<1x128xf32> to vector<1x128xf32>
    %6 = vector.broadcast %5 : vector<1x128xf32> to vector<8x128xf32>
    %c0_4 = arith.constant 0 : index
    %c0_5 = arith.constant 0 : index
    %7 = vector.load %arg4[%c0_4, %c0_5] : memref<1x128xf32, #tpu.memory_space<vmem>>, vector<1x128xf32>
    %8 = vector.shape_cast %7 : vector<1x128xf32> to vector<1x128xf32>
    %9 = vector.broadcast %8 : vector<1x128xf32> to vector<8x128xf32>
    %c0_6 = arith.constant 0 : index
    %c0_7 = arith.constant 0 : index
    %10 = vector.load %arg6[%c0_6, %c0_7] : memref<8x128xf32, #tpu.memory_space<vmem>>, vector<8x128xf32>
    %c0_8 = arith.constant 0 : index
    %c0_9 = arith.constant 0 : index
    %11 = vector.load %arg7[%c0_8, %c0_9] : memref<8x128xf32, #tpu.memory_space<vmem>>, vector<8x128xf32>
    %c0_10 = arith.constant 0 : index
    %c0_11 = arith.constant 0 : index
    %12 = vector.load %arg8[%c0_10, %c0_11] : memref<8x128xf32, #tpu.memory_space<vmem>>, vector<8x128xf32>
    %cst = arith.constant 8.000000e-03 : f32
    %cst_12 = arith.constant 0.000000e+00 : f32
    %cst_13 = arith.constant 9.989500e-01 : f32
    %cst_14 = arith.constant 1.050000e-03 : f32
    %cst_15 = arith.constant 4.200000e-02 : f32
    %c0_i32_16 = arith.constant 0 : i32
    %13 = arith.index_cast %c0_i32_16 : i32 to index
    %c0_17 = arith.constant 0 : index
    %c0_18 = arith.constant 0 : index
    %14 = vector.load %arg1[%13, %c0_17, %c0_18] : memref<4x8x128xf32, #tpu.memory_space<vmem>>, vector<1x8x128xf32>
    %15 = vector.shape_cast %14 : vector<1x8x128xf32> to vector<8x128xf32>
    %16 = vector.broadcast %cst : f32 to vector<8x128xf32>
    %17 = arith.cmpf ogt, %12, %16 : vector<8x128xf32>
    %18 = arith.extui %17 : vector<8x128xi1> to vector<8x128xi32>
    %19 = arith.sitofp %18 : vector<8x128xi32> to vector<8x128xf32>
    %20 = vector.broadcast %cst_12 : f32 to vector<8x128xf32>
    %21 = arith.select %17, %20, %12 : vector<8x128xi1>, vector<8x128xf32>
    %22 = vector.broadcast %cst_13 : f32 to vector<8x128xf32>
    %23 = arith.mulf %21, %22 : vector<8x128xf32>
    %cst_19 = arith.constant dense<0.000000e+00> : vector<8x128xf32>
    %24 = tpu.matmul %10, %3, %cst_19 {dimension_numbers = #tpu.dot_dimension_numbers<[1], [0], [0], [1], [0, 0, 1, 1], [], []>} : vector<8x128xf32>, vector<128x128xf32>, vector<8x128xf32> -> vector<8x128xf32>
    %25 = arith.addf %24, %15 : vector<8x128xf32>
    %26 = vector.broadcast %cst_14 : f32 to vector<8x128xf32>
    %27 = arith.mulf %26, %25 : vector<8x128xf32>
    %28 = arith.addf %23, %27 : vector<8x128xf32>
    %29 = vector.broadcast %cst_15 : f32 to vector<8x128xf32>
    %30 = arith.mulf %29, %28 : vector<8x128xf32>
    %31 = arith.addf %11, %30 : vector<8x128xf32>
    %32 = arith.mulf %6, %10 : vector<8x128xf32>
    %33 = arith.subf %31, %32 : vector<8x128xf32>
    %34 = arith.mulf %9, %11 : vector<8x128xf32>
    %35 = arith.subf %33, %34 : vector<8x128xf32>
    %36 = vector.broadcast %cst_15 : f32 to vector<8x128xf32>
    %37 = arith.mulf %36, %35 : vector<8x128xf32>
    %38 = arith.addf %10, %37 : vector<8x128xf32>
    %39 = tpu.concatenate %38, %35, %28, %19 in 1 : vector<8x128xf32>, vector<8x128xf32>, vector<8x128xf32>, vector<8x128xf32> -> vector<8x512xf32>
    %40 = arith.index_cast %c0_i32_16 : i32 to index
    %c0_20 = arith.constant 0 : index
    %c0_21 = arith.constant 0 : index
    %41 = vector.load %arg5[%40, %c0_20, %c0_21] : memref<4x8x512xf32, #tpu.memory_space<vmem>>, vector<1x8x512xf32>
    %42 = vector.shape_cast %41 : vector<1x8x512xf32> to vector<8x512xf32>
    %43 = vector.shape_cast %39 : vector<8x512xf32> to vector<1x8x512xf32>
    tpu.vector_store %arg5[%40, %c0_20, %c0_21], %43 {strides = array<i32>} : memref<4x8x512xf32, #tpu.memory_space<vmem>>, vector<1x8x512xf32>,
    %c1_i32 = arith.constant 1 : i32
    %44 = arith.index_cast %c1_i32 : i32 to index
    %c0_22 = arith.constant 0 : index
    %c0_23 = arith.constant 0 : index
    %45 = vector.load %arg1[%44, %c0_22, %c0_23] : memref<4x8x128xf32, #tpu.memory_space<vmem>>, vector<1x8x128xf32>
    %46 = vector.shape_cast %45 : vector<1x8x128xf32> to vector<8x128xf32>
    %47 = vector.broadcast %cst : f32 to vector<8x128xf32>
    %48 = arith.cmpf ogt, %28, %47 : vector<8x128xf32>
    %49 = arith.extui %48 : vector<8x128xi1> to vector<8x128xi32>
    %50 = arith.sitofp %49 : vector<8x128xi32> to vector<8x128xf32>
    %51 = vector.broadcast %cst_12 : f32 to vector<8x128xf32>
    %52 = arith.select %48, %51, %28 : vector<8x128xi1>, vector<8x128xf32>
    %53 = vector.broadcast %cst_13 : f32 to vector<8x128xf32>
    %54 = arith.mulf %52, %53 : vector<8x128xf32>
    %cst_24 = arith.constant dense<0.000000e+00> : vector<8x128xf32>
    %55 = tpu.matmul %38, %3, %cst_24 {dimension_numbers = #tpu.dot_dimension_numbers<[1], [0], [0], [1], [0, 0, 1, 1], [], []>} : vector<8x128xf32>, vector<128x128xf32>, vector<8x128xf32> -> vector<8x128xf32>
    %56 = arith.addf %55, %46 : vector<8x128xf32>
    %57 = vector.broadcast %cst_14 : f32 to vector<8x128xf32>
    %58 = arith.mulf %57, %56 : vector<8x128xf32>
    %59 = arith.addf %54, %58 : vector<8x128xf32>
    %60 = vector.broadcast %cst_15 : f32 to vector<8x128xf32>
    %61 = arith.mulf %60, %59 : vector<8x128xf32>
    %62 = arith.addf %35, %61 : vector<8x128xf32>
    %63 = arith.mulf %6, %38 : vector<8x128xf32>
    %64 = arith.subf %62, %63 : vector<8x128xf32>
    %65 = arith.mulf %9, %35 : vector<8x128xf32>
    %66 = arith.subf %64, %65 : vector<8x128xf32>
    %67 = vector.broadcast %cst_15 : f32 to vector<8x128xf32>
    %68 = arith.mulf %67, %66 : vector<8x128xf32>
    %69 = arith.addf %38, %68 : vector<8x128xf32>
    %70 = tpu.concatenate %69, %66, %59, %50 in 1 : vector<8x128xf32>, vector<8x128xf32>, vector<8x128xf32>, vector<8x128xf32> -> vector<8x512xf32>
    %71 = arith.index_cast %c1_i32 : i32 to index
    %c0_25 = arith.constant 0 : index
    %c0_26 = arith.constant 0 : index
    %72 = vector.load %arg5[%71, %c0_25, %c0_26] : memref<4x8x512xf32, #tpu.memory_space<vmem>>, vector<1x8x512xf32>
    %73 = vector.shape_cast %72 : vector<1x8x512xf32> to vector<8x512xf32>
    %74 = vector.shape_cast %70 : vector<8x512xf32> to vector<1x8x512xf32>
    tpu.vector_store %arg5[%71, %c0_25, %c0_26], %74 {strides = array<i32>} : memref<4x8x512xf32, #tpu.memory_space<vmem>>, vector<1x8x512xf32>,
    %c2_i32 = arith.constant 2 : i32
    %75 = arith.index_cast %c2_i32 : i32 to index
    %c0_27 = arith.constant 0 : index
    %c0_28 = arith.constant 0 : index
    %76 = vector.load %arg1[%75, %c0_27, %c0_28] : memref<4x8x128xf32, #tpu.memory_space<vmem>>, vector<1x8x128xf32>
    %77 = vector.shape_cast %76 : vector<1x8x128xf32> to vector<8x128xf32>
    %78 = vector.broadcast %cst : f32 to vector<8x128xf32>
    %79 = arith.cmpf ogt, %59, %78 : vector<8x128xf32>
    %80 = arith.extui %79 : vector<8x128xi1> to vector<8x128xi32>
    %81 = arith.sitofp %80 : vector<8x128xi32> to vector<8x128xf32>
    %82 = vector.broadcast %cst_12 : f32 to vector<8x128xf32>
    %83 = arith.select %79, %82, %59 : vector<8x128xi1>, vector<8x128xf32>
    %84 = vector.broadcast %cst_13 : f32 to vector<8x128xf32>
    %85 = arith.mulf %83, %84 : vector<8x128xf32>
    %cst_29 = arith.constant dense<0.000000e+00> : vector<8x128xf32>
    %86 = tpu.matmul %69, %3, %cst_29 {dimension_numbers = #tpu.dot_dimension_numbers<[1], [0], [0], [1], [0, 0, 1, 1], [], []>} : vector<8x128xf32>, vector<128x128xf32>, vector<8x128xf32> -> vector<8x128xf32>
    %87 = arith.addf %86, %77 : vector<8x128xf32>
    %88 = vector.broadcast %cst_14 : f32 to vector<8x128xf32>
    %89 = arith.mulf %88, %87 : vector<8x128xf32>
    %90 = arith.addf %85, %89 : vector<8x128xf32>
    %91 = vector.broadcast %cst_15 : f32 to vector<8x128xf32>
    %92 = arith.mulf %91, %90 : vector<8x128xf32>
    %93 = arith.addf %66, %92 : vector<8x128xf32>
    %94 = arith.mulf %6, %69 : vector<8x128xf32>
    %95 = arith.subf %93, %94 : vector<8x128xf32>
    %96 = arith.mulf %9, %66 : vector<8x128xf32>
    %97 = arith.subf %95, %96 : vector<8x128xf32>
    %98 = vector.broadcast %cst_15 : f32 to vector<8x128xf32>
    %99 = arith.mulf %98, %97 : vector<8x128xf32>
    %100 = arith.addf %69, %99 : vector<8x128xf32>
    %101 = tpu.concatenate %100, %97, %90, %81 in 1 : vector<8x128xf32>, vector<8x128xf32>, vector<8x128xf32>, vector<8x128xf32> -> vector<8x512xf32>
    %102 = arith.index_cast %c2_i32 : i32 to index
    %c0_30 = arith.constant 0 : index
    %c0_31 = arith.constant 0 : index
    %103 = vector.load %arg5[%102, %c0_30, %c0_31] : memref<4x8x512xf32, #tpu.memory_space<vmem>>, vector<1x8x512xf32>
    %104 = vector.shape_cast %103 : vector<1x8x512xf32> to vector<8x512xf32>
    %105 = vector.shape_cast %101 : vector<8x512xf32> to vector<1x8x512xf32>
    tpu.vector_store %arg5[%102, %c0_30, %c0_31], %105 {strides = array<i32>} : memref<4x8x512xf32, #tpu.memory_space<vmem>>, vector<1x8x512xf32>,
    %c3_i32 = arith.constant 3 : i32
    %106 = arith.index_cast %c3_i32 : i32 to index
    %c0_32 = arith.constant 0 : index
    %c0_33 = arith.constant 0 : index
    %107 = vector.load %arg1[%106, %c0_32, %c0_33] : memref<4x8x128xf32, #tpu.memory_space<vmem>>, vector<1x8x128xf32>
    %108 = vector.shape_cast %107 : vector<1x8x128xf32> to vector<8x128xf32>
    %109 = vector.broadcast %cst : f32 to vector<8x128xf32>
    %110 = arith.cmpf ogt, %90, %109 : vector<8x128xf32>
    %111 = arith.extui %110 : vector<8x128xi1> to vector<8x128xi32>
    %112 = arith.sitofp %111 : vector<8x128xi32> to vector<8x128xf32>
    %113 = vector.broadcast %cst_12 : f32 to vector<8x128xf32>
    %114 = arith.select %110, %113, %90 : vector<8x128xi1>, vector<8x128xf32>
    %115 = vector.broadcast %cst_13 : f32 to vector<8x128xf32>
    %116 = arith.mulf %114, %115 : vector<8x128xf32>
    %cst_34 = arith.constant dense<0.000000e+00> : vector<8x128xf32>
    %117 = tpu.matmul %100, %3, %cst_34 {dimension_numbers = #tpu.dot_dimension_numbers<[1], [0], [0], [1], [0, 0, 1, 1], [], []>} : vector<8x128xf32>, vector<128x128xf32>, vector<8x128xf32> -> vector<8x128xf32>
    %118 = arith.addf %117, %108 : vector<8x128xf32>
    %119 = vector.broadcast %cst_14 : f32 to vector<8x128xf32>
    %120 = arith.mulf %119, %118 : vector<8x128xf32>
    %121 = arith.addf %116, %120 : vector<8x128xf32>
    %122 = vector.broadcast %cst_15 : f32 to vector<8x128xf32>
    %123 = arith.mulf %122, %121 : vector<8x128xf32>
    %124 = arith.addf %97, %123 : vector<8x128xf32>
    %125 = arith.mulf %6, %100 : vector<8x128xf32>
    %126 = arith.subf %124, %125 : vector<8x128xf32>
    %127 = arith.mulf %9, %97 : vector<8x128xf32>
    %128 = arith.subf %126, %127 : vector<8x128xf32>
    %129 = vector.broadcast %cst_15 : f32 to vector<8x128xf32>
    %130 = arith.mulf %129, %128 : vector<8x128xf32>
    %131 = arith.addf %100, %130 : vector<8x128xf32>
    %132 = tpu.concatenate %131, %128, %121, %112 in 1 : vector<8x128xf32>, vector<8x128xf32>, vector<8x128xf32>, vector<8x128xf32> -> vector<8x512xf32>
    %133 = arith.index_cast %c3_i32 : i32 to index
    %c0_35 = arith.constant 0 : index
    %c0_36 = arith.constant 0 : index
    %134 = vector.load %arg5[%133, %c0_35, %c0_36] : memref<4x8x512xf32, #tpu.memory_space<vmem>>, vector<1x8x512xf32>
    %135 = vector.shape_cast %134 : vector<1x8x512xf32> to vector<8x512xf32>
    %136 = vector.shape_cast %132 : vector<8x512xf32> to vector<1x8x512xf32>
    tpu.vector_store %arg5[%133, %c0_35, %c0_36], %136 {strides = array<i32>} : memref<4x8x512xf32, #tpu.memory_space<vmem>>, vector<1x8x512xf32>,
    %c4_i32 = arith.constant 4 : i32
    %c0_37 = arith.constant 0 : index
    %c0_38 = arith.constant 0 : index
    %137 = vector.load %arg6[%c0_37, %c0_38] : memref<8x128xf32, #tpu.memory_space<vmem>>, vector<8x128xf32>
    tpu.vector_store %arg6[%c0_37, %c0_38], %131 {strides = array<i32>} : memref<8x128xf32, #tpu.memory_space<vmem>>, vector<8x128xf32>,
    %c0_39 = arith.constant 0 : index
    %c0_40 = arith.constant 0 : index
    %138 = vector.load %arg7[%c0_39, %c0_40] : memref<8x128xf32, #tpu.memory_space<vmem>>, vector<8x128xf32>
    tpu.vector_store %arg7[%c0_39, %c0_40], %128 {strides = array<i32>} : memref<8x128xf32, #tpu.memory_space<vmem>>, vector<8x128xf32>,
    %c0_41 = arith.constant 0 : index
    %c0_42 = arith.constant 0 : index
    %139 = vector.load %arg8[%c0_41, %c0_42] : memref<8x128xf32, #tpu.memory_space<vmem>>, vector<8x128xf32>
    tpu.vector_store %arg8[%c0_41, %c0_42], %121 {strides = array<i32>} : memref<8x128xf32, #tpu.memory_space<vmem>>, vector<8x128xf32>,
    return
  }
  func.func @transform_0(%arg0: i32) -> (i32, i32, i32) {
    %c0_i32 = arith.constant 0 : i32
    %c0_i32_0 = arith.constant 0 : i32
    %c0_i32_1 = arith.constant 0 : i32
    return %arg0, %c0_i32, %c0_i32_0 : i32, i32, i32
  }
  func.func @transform_1(%arg0: i32) -> (i32, i32) {
    %c0_i32 = arith.constant 0 : i32
    %c0_i32_0 = arith.constant 0 : i32
    %c0_i32_1 = arith.constant 0 : i32
    return %c0_i32, %c0_i32_0 : i32, i32
  }
  func.func @transform_2(%arg0: i32) -> (i32, i32) {
    %c0_i32 = arith.constant 0 : i32
    %c0_i32_0 = arith.constant 0 : i32
    %c0_i32_1 = arith.constant 0 : i32
    return %c0_i32, %c0_i32_0 : i32, i32
  }
  func.func @transform_3(%arg0: i32) -> (i32, i32) {
    %c0_i32 = arith.constant 0 : i32
    %c0_i32_0 = arith.constant 0 : i32
    %c0_i32_1 = arith.constant 0 : i32
    return %c0_i32, %c0_i32_0 : i32, i32
  }
  func.func @transform_4(%arg0: i32) -> (i32, i32, i32) {
    %c0_i32 = arith.constant 0 : i32
    %c0_i32_0 = arith.constant 0 : i32
    %c0_i32_1 = arith.constant 0 : i32
    return %arg0, %c0_i32, %c0_i32_0 : i32, i32, i32
  }
}

</mosaic_0001>

<bundles_post_ra>
// kernel: tpu_custom_call.1
= control target key start
LH: loop header
LB: loop body
LE: loop exit
PB: predicated region body
PF: predicated region fallthrough
CT: control target
= control target key end

     0   :  { %9 = vsyncpa [#allocation6], 0  ;;  %s1671_s0 = inlined_call_operand.hbm [shape: f32[8,8,128], index: 0, kind: input, shape index: {}]   ;;  %s1672_s1 = inlined_call_operand.hbm [shape: f32[128,128], index: 1, kind: input, shape index: {}]   ;;  %s1673_s2 = inlined_call_operand.vmem [shape: f32[1,128], index: 2, kind: input, shape index: {}]   ;;  %s1674_s3 = inlined_call_operand.vmem [shape: f32[1,128], index: 3, kind: input, shape index: {}]   ;;  %s1675_s4 = inlined_call_operand.hbm [shape: f32[8,8,512], index: 4, kind: output, shape index: {}]  }
   0x1   :  { %11 = vsyncpa [#allocation6 + $0x1], 0 }
   0x2   :  { %12 = vsyncpa [#allocation9], 0 }
   0x3   :  { %13 = vsyncpa [#allocation7], 0 }
   0x4   :  { %15 = vsyncpa [#allocation7 + $0x1], 0  ;;  %s1317_s15 = smov 0   ;;  %s1319_s16 = smov 0  }
   0x5   :  { %s1321_s17 = smov 0   ;;  %s1323_s18 = smov 0  }
   0x6 LB: > { %s1338_s19 = sadd.s32 4294967295, %s1279_s18   ;;  %s740_s20 = sadd.s32 4294967294, %s1279_s18   ;;  %s1279_s18 = sphi %s1323_s18, %s1696_s18   ;;  %s1275_s17 = sphi %s1321_s17, %s1695_s17   ;;  %s1271_s16 = sphi %s1319_s16, %s1694_s16   ;;  %s1267_s15 = sphi %s1317_s15, %s1693_s15  }
   0x7   : > { %p41_p0 = scmp.ne.s32.totalorder %s1271_s16, %s1267_s15  ;;  %p1676_p1 = scmp.eq.s32.totalorder %s1338_s19, 0 }
   0x8   : > { %p134_p3 = scmp.eq.s32.totalorder %s740_s20, 1  ;;  %p741_p5 = scmp.ge.s32.totalorder %s1279_s18, 1 }
   0x9   : > { %p1347_p4 = por %p1676_p1, %p41_p0  ;;  %p141_p7 = scmp.lt.s32.totalorder %s1279_s18, 3 }
   0xa   : > { %p1352_p6 = por %p134_p3, %p41_p0  ;;  %s1281_s24 = smov [#allocation8]  }
   0xb   : > { %s1679_s21 = scalar_select %p1347_p4, 1, 0 }
   0xc   : > { %s1680_s22 = scalar_select %p1352_p6, 1, 0 }
   0xd   : > { %p1358_p9 = pnand %p741_p5, %p141_p7  ;;  %s153_s25 = sshll.u32 %s1281_s24, 4  ;;  %s1362_s25 = int_to_ptr.vmem [resolvable:$true] %s153_s25 }
   0xe   : > { %s1374_s27 = sadd.s32 1, %s1279_s18   ;;  %s28_s28 = sadd.s32 1, %s1275_s17 }
   0xf   : > { %s1681_s23 = scalar_select %p1358_p9, 1, 0 }
  0x10   : > { %p1094_p10 = pneg %p1358_p9  ;;  %s25_s29 = ssub.s32 %s1279_s18, %s1374_s27 }
  0x11   : > { %s1151_s6 = scalar_lea.hbm %s1672_s1, 2048 }
  0x12   : > { %p1369_p12 = pnand %p1094_p10, %p1676_p1  ;;  %p1152_p13 = scmp.ne.s32.totalorder %s1672_s1, %s1151_s6 }
  0x13   : > { %p1158_p7 = scmp.lt.u32.totalorder %s1151_s6, %s1672_s1 }
  0x14   : > { %p1153_p0 = pneg %p1369_p12 }
  0x16   : > { %p1154_p3 = pnand %p1153_p0, %p1152_p13 }
  0x18   : > { %p1155_p5 = pneg %p1154_p3 }
  0x1a   : > { %p1160_p10 = pnand %p1158_p7, %p1155_p5 }
  0x1c   : > { %1163 = shalt.err (!%p1160_p10)
}
  0x1d   : > { %s1164_s11 = scalar_lea.vmem %s1362_s25, 2048  ;;  %p1172_p2 = scmp.lt.s32.totalorder %s1362_s25, %s1362_s25 }
  0x1e   : > { %p1165_p11 = scmp.ne.s32.totalorder %s1362_s25, %s1164_s11  ;;  %p1173_p6 = scmp.lt.s32.totalorder %s1164_s11, %s1164_s11 }
  0x20   : > { %p1167_p8 = pnand %p1165_p11, %p1153_p0  ;;  %p1174_p4 = por %p1173_p6, %p1172_p2 }
  0x22   : > { %p1168_p1 = pneg %p1167_p8 }
  0x24   : > { %p1175_p9 = pnand %p1174_p4, %p1168_p1 }
  0x26   : > { %1178 = shalt.err (!%p1175_p9)
}
  0x27   : > { %s1282_s12 = smov 128   ;;  %s1283_s13 = smov 8  }
  0x28   : > { %1097 = dma.hbm_to_vmem [thread:$0]  (!%p1369_p12), %s1672_s1, 2048, %s1362_s25, [#allocation9], %s1282_s12, %s1282_s12, %s1283_s13  }
  0x29   : > { %p26_p1 = scmp.eq.s32.totalorder %s25_s29, 0  ;;  %p35_p2 = scmp.ne.s32.totalorder %s1275_s17, %s1271_s16 }
  0x2a   : > { %p36_p4 = scmp.eq.s32.totalorder %s1279_s18, 0  ;;  %p1107_p6 = scmp.lt.s32.totalorder %s1279_s18, 2 }
  0x2b   : > { %s1408_s24 = scalar_select %p26_p1, %s1275_s17, %s28_s28  }
  0x2c   : > { %p37_p8 = por %p36_p4, %p35_p2  ;;  %p1683_p9 = scmp.eq.s32.totalorder %s1338_s19, 1 }
  0x2d   : > { %s173_s26 = sand.u32 1, %s1275_s17   ;;  %s779_s5 = sshll.u32 %s1279_s18, 9 }
  0x2e   : > { %p1412_p11 = por %p1683_p9, %p35_p2  ;;  %s744_s6 = sshll.u32 %s173_s26, 5 }
  0x2f   : > { %s1421_s9 = scalar_lea.hbm %s1671_s0, %s779_s5  ;;  %s177_s25 = scalar_lea.vmem [#allocation5], %s744_s6 }
  0x30   : > { %s184_s28 = sshll.u32 %s177_s25, 4  ;;  %p1423_p12 = pnand %p1107_p6, %p37_p8  ;;  %s1427_s28 = int_to_ptr.vmem [resolvable:$true] %s184_s28 }
  0x31   : > { %s1429_s10 = scalar_lea.sflag [#allocation6], %s173_s26  ;;  %s1179_s11 = scalar_lea.hbm %s1421_s9, 512 }
  0x32   : > { %p1180_p13 = scmp.ne.s32.totalorder %s1421_s9, %s1179_s11  ;;  %p1181_p0 = pneg %p1423_p12 }
  0x33   : > { %s1184_s5 = scalar_lea.hbm %s1671_s0, 1024  ;;  %p1185_p7 = scmp.lt.u32.totalorder %s1421_s9, %s1671_s0 }
  0x34   : > { %p1182_p3 = pnand %p1181_p0, %p1180_p13  ;;  %p1186_p10 = scmp.lt.u32.totalorder %s1184_s5, %s1179_s11 }
  0x35   : > { %p1188_p2 = scmp.lt.u32.totalorder %s1179_s11, %s1421_s9 }
  0x36   : > { %p1183_p5 = pneg %p1182_p3  ;;  %p1187_p1 = por %p1186_p10, %p1185_p7 }
  0x38   : > { %p1189_p4 = por %p1188_p2, %p1187_p1 }
  0x3a   : > { %p1190_p6 = pnand %p1189_p4, %p1183_p5 }
  0x3c   : > { %1193 = shalt.err (!%p1190_p6)
}
  0x3d   : > { %s1194_s26 = scalar_lea.vmem %s1427_s28, 512  ;;  %s1284_s8 = smov [#allocation5]  }
  0x3e   : > { %p1195_p8 = scmp.ne.s32.totalorder %s1427_s28, %s1194_s26  ;;  %s1199_s25 = sshll.u32 %s1284_s8, 4  ;;  %s1200_s25 = int_to_ptr.vmem [resolvable:$false] %s1199_s25 }
  0x3f   : > { %s1201_s14 = scalar_lea.vmem %s1200_s25, 1024  ;;  %p1202_p3 = scmp.lt.s32.totalorder %s1427_s28, %s1200_s25 }
  0x40   : > { %p1197_p9 = pnand %p1195_p8, %p1181_p0  ;;  %p1203_p7 = scmp.lt.s32.totalorder %s1201_s14, %s1194_s26 }
  0x42   : > { %p1198_p13 = pneg %p1197_p9  ;;  %p1204_p10 = por %p1203_p7, %p1202_p3 }
  0x44   : > { %p1205_p1 = pnand %p1204_p10, %p1198_p13 }
  0x46   : > { %1208 = shalt.err (!%p1205_p1)
}
  0x47   : > { %1101 = dma.hbm_to_vmem [thread:$0]  (!%p1423_p12), %s1421_s9, 512, %s1427_s28, %s1429_s10, %s1282_s12, %s1282_s12, %s1283_s13  }
  0x48   : > { %p1686_p0 = scmp.ne.s32.totalorder %s1681_s23, 0 }
  0x49   : > { %s1463_s11 = sand.u32 (!%p1686_p0), 1, %s1271_s16   ;;  %p1687_p5 = scmp.ne.s32.totalorder (!%p1686_p0), %s1679_s21, 0 }
  0x4a   : > { %196 = sbr.rel (%p1686_p0) target bundleno = 1063 (0x427), region = 36  ;;  %s748_s20 = sshll.u32 (!%p1686_p0), %s1463_s11, 5 }
  0x4b   : > { %s199_s5 = scalar_lea.sflag (!%p1686_p0), [#allocation6], %s1463_s11  ;;  %s1467_s6 = scalar_lea.vmem (!%p1686_p0), [#allocation5], %s748_s20 }
  0x51   : > { %1254 = dma.done.wait (%p1687_p5), %s199_s5, 512  }
  0x52   : > { %1256 = vsyncadd (%p1687_p5), %s199_s5, 4294966784  ;;  %p1688_p12 = scmp.eq.s32.totalorder %s1338_s19, 0 }
  0x54   : > { %1258 = dma.done.wait (%p1688_p12), [#allocation9], 2048   ;;  %p1689_p2 = pmov %p1688_p12 }
  0x55   : > { %s750_s23 = sshll.u32 %s1463_s11, 7  ;;  %p1690_p4 = scmp.ne.s32.totalorder %s1338_s19, 0 }
  0x56   : > { %1260 = vsyncadd (%p1689_p2), [#allocation9], 4294965248  ;;  %s1478_s12 = scalar_lea.vmem [#allocation10], %s750_s23  ;;  %v1285_v0 = vmov (!%p1690_p4), 0.0  }
  0x57   : > { %236 = sbr.rel (%p1690_p4) target bundleno = 94 (0x5e), region = 48  ;;  %237 = vst [vmem:[#allocation2] sm:$0xff] (!%p1690_p4), %v1285_v0  ;;  %238 = vst [vmem:[#allocation3] sm:$0xff] (!%p1690_p4), %v1285_v0 }
  0x58   : > { %239 = vst [vmem:[#allocation4] sm:$0xff] (!%p1690_p4), %v1285_v0 }
  0x5e PF: > { %v240_v1 = vld [vmem:[#allocation8] sm:$0xff]  ;;  %v241_v2 = vld [vmem:[#allocation8 + $0x8] sm:$0xff]  ;;  %v242_v3 = vld [vmem:[#allocation8 + $0x10] sm:$0xff]  ;;  %v1286_v4 = vmov 0.0|0.0   ;;  %vm1287_vm0 = vmmov 0   ;;  %v1288_v7 = vmov 0.0  }
  0x5f   : > { %990 = vmatprep.subr.bf16.mxu0 %v1286_v4  ;;  %v1483_v5 = vpack.c.bf16 %v241_v2, %v240_v1  ;;  %v243_v6 = vld [vmem:[#allocation8 + $0x18] sm:$0xff]  ;;  %882 = vmatprep.mubr.msk.f32.mxu0 %vm1287_vm0, %v1288_v7  ;;  %v244_v9 = vld [vmem:[#allocation8 + $0x20] sm:$0xff]  ;;  %v245_v10 = vld [vmem:[#allocation8 + $0x28] sm:$0xff]  ;;  %s781_s29 = sshll.u32 %s1338_s19, 11  ;;  %s657_s10 = sshll.u32 %s1478_s12, 4  ;;  %s1626_s10 = int_to_ptr.vmem [resolvable:$true] %s657_s10 }
  0x60   : > { %1014 = vmatprep.subr.bf16.mxu1 %v1286_v4  ;;  %917 = vmatprep.mubr.msk.f32.mxu1 %vm1287_vm0, %v1288_v7  ;;  %v1491_v8 = vpack.c.bf16 %v243_v6, %v242_v3  ;;  %v1496_v11 = vld [vmem:[#allocation4] sm:$0xff]  ;;  %v1499_v12 = vpack.c.bf16 %v245_v10, %v244_v9  ;;  %v246_v13 = vld [vmem:[#allocation8 + $0x30] sm:$0xff]  ;;  %v248_v17 = vld [vmem:[#allocation8 + $0x40] sm:$0xff]  ;;  %s1624_s8 = scalar_lea.hbm %s1675_s4, %s781_s29  ;;  %s643_s25 = scalar_lea.sflag [#allocation7], %s1463_s11 }
  0x61   : > { %992 = vmatpush3.bf16.msra.mxu0 %v1483_v5  ;;  %1016 = vmatpush3.bf16.msra.mxu1 %v1483_v5  ;;  %vm274_vm1 = vcmp.gt.f32.partialorder %v1496_v11, 0.008  ;;  %v247_v14 = vld [vmem:[#allocation8 + $0x38] sm:$0xff]  ;;  %v249_v18 = vld [vmem:[#allocation8 + $0x48] sm:$0xff]  ;;  %v250_v20 = vld [vmem:[#allocation8 + $0x50] sm:$0xff]  ;;  %s1209_s14 = scalar_lea.vmem %s1626_s10, 2048 }
  0x62   : > { %993 = vmatprep.subr.bf16.mxu0 %v1286_v4  ;;  %1017 = vmatprep.subr.bf16.mxu1 %v1286_v4  ;;  %v754_v15 = vsel %vm274_vm1, 1.0, %v1288_v7  ;;  %v1510_v16 = vpack.c.bf16 %v247_v14, %v246_v13  ;;  %v1516_v19 = vpack.c.bf16 %v249_v18, %v248_v17  ;;  %v251_v21 = vld [vmem:[#allocation8 + $0x58] sm:$0xff]  ;;  %v252_v23 = vld [vmem:[#allocation8 + $0x60] sm:$0xff]  ;;  %v253_v24 = vld [vmem:[#allocation8 + $0x68] sm:$0xff]  ;;  %v277_v31 = vsel %vm274_vm1, 0.0, %v1496_v11  ;;  %p1210_p6 = scmp.ne.s32.totalorder %s1626_s10, %s1209_s14  ;;  %s1289_s19 = smov [#allocation10]  }
  0x63   : > { %362 = vst [vmem:[%s1478_s12 + $0x18] sm:$0xff] %v754_v15  ;;  %v1522_v22 = vpack.c.bf16 %v251_v21, %v250_v20  ;;  %v1528_v25 = vpack.c.bf16 %v253_v24, %v252_v23  ;;  %v254_v26 = vld [vmem:[#allocation8 + $0x70] sm:$0xff]  ;;  %v255_v27 = vld [vmem:[#allocation8 + $0x78] sm:$0xff]  ;;  %v270_v29 = vld [vmem:[#allocation2] sm:$0xff]  ;;  %v278_v33 = vmul.f32 0.99895, %v277_v31 }
  0x64   : > { %v1534_v28 = vpack.c.bf16 %v255_v27, %v254_v26  ;;  %v273_v30 = vld [vmem:[%s1467_s6] sm:$0xff]  ;;  %v1567_v37 = vld [vmem:[%s1673_s2] ss:$0 sm:$0xff]  ;;  %v271_v40 = vld [vmem:[#allocation3] sm:$0xff]  ;;  %p1211_p8 = pnand %p1210_p6, %p1412_p11  ;;  %s1213_s20 = sshll.u32 %s1289_s19, 4  ;;  %s1214_s20 = int_to_ptr.vmem [resolvable:$false] %s1213_s20 }
  0x65   : > { %995 = vmatpush3.bf16.msra.mxu0 %v1491_v8  ;;  %1019 = vmatpush3.bf16.msra.mxu1 %v1491_v8  ;;  %v1572_v39 = vld [vmem:[%s1674_s3] ss:$0 sm:$0xff]  ;;  %v353_v41 = vmul.f32 %v1567_v37, %v270_v29  ;;  %s1215_s5 = scalar_lea.vmem %s1214_s20, 4096  ;;  %p1216_p13 = scmp.lt.s32.totalorder %s1626_s10, %s1214_s20 }
  0x66   : > { %996 = vmatprep.subr.bf16.mxu0 %v1286_v4  ;;  %1020 = vmatprep.subr.bf16.mxu1 %v1286_v4  ;;  %v355_v46 = vmul.f32 %v1572_v39, %v271_v40  ;;  %v755_v51 = vld [vmem:[%s1467_s6 + $0x8] sm:$0xff]  ;;  %p1212_p9 = pneg %p1211_p8  ;;  %p1217_p3 = scmp.lt.s32.totalorder %s1215_s5, %s1209_s14 }
  0x68   : > { %p1218_p7 = por %p1217_p3, %p1216_p13 }
  0x69   : > { %998 = vmatpush3.bf16.msra.mxu0 %v1499_v12  ;;  %1022 = vmatpush3.bf16.msra.mxu1 %v1499_v12 }
  0x6a   : > { %999 = vmatprep.subr.bf16.mxu0 %v1286_v4  ;;  %1023 = vmatprep.subr.bf16.mxu1 %v1286_v4  ;;  %p1219_p10 = pnand %p1218_p7, %p1212_p9 }
  0x6d   : > { %1001 = vmatpush3.bf16.msra.mxu0 %v1510_v16  ;;  %1025 = vmatpush3.bf16.msra.mxu1 %v1510_v16 }
  0x6e   : > { %1002 = vmatprep.subr.bf16.mxu0 %v1286_v4  ;;  %1026 = vmatprep.subr.bf16.mxu1 %v1286_v4 }
  0x71   : > { %1004 = vmatpush3.bf16.msra.mxu0 %v1516_v19  ;;  %1028 = vmatpush3.bf16.msra.mxu1 %v1516_v19 }
  0x72   : > { %1005 = vmatprep.subr.bf16.mxu0 %v1286_v4  ;;  %1029 = vmatprep.subr.bf16.mxu1 %v1286_v4 }
  0x75   : > { %1007 = vmatpush3.bf16.msra.mxu0 %v1522_v22  ;;  %1031 = vmatpush3.bf16.msra.mxu1 %v1522_v22 }
  0x76   : > { %1008 = vmatprep.subr.bf16.mxu0 %v1286_v4  ;;  %1032 = vmatprep.subr.bf16.mxu1 %v1286_v4 }
  0x79   : > { %1010 = vmatpush3.bf16.msra.mxu0 %v1528_v25  ;;  %1034 = vmatpush3.bf16.msra.mxu1 %v1528_v25 }
  0x7a   : > { %1011 = vmatprep.subr.bf16.mxu0 %v1286_v4  ;;  %1035 = vmatprep.subr.bf16.mxu1 %v1286_v4 }
  0x7d   : > { %1013 = vmatpush3.bf16.msra.mxu0 %v1534_v28  ;;  %1037 = vmatpush3.bf16.msra.mxu1 %v1534_v28 }
  0x7e   : > { %1038 = vmatprep.subr.bf16.mxu0 %v1286_v4  ;;  %1062 = vmatprep.subr.bf16.mxu1 %v1286_v4 }
  0x80   : > { %883 = vmatmul.mubr.f32.vlgmr.msra.gmra.mrb[0].mxu0 %v270_v29 }
  0x81   : > { %1040 = vmatpush3.bf16.msra.mxu0 %v1483_v5  ;;  %952 = vmatprep.mubr.msk.f32.mxu0 %vm1287_vm0, %v1288_v7 }
  0x82   : > { %1041 = vmatprep.subr.bf16.mxu0 %v1286_v4 }
  0x85   : > { %1043 = vmatpush3.bf16.msra.mxu0 %v1491_v8 }
  0x86   : > { %1044 = vmatprep.subr.bf16.mxu0 %v1286_v4 }
  0x89   : > { %1046 = vmatpush3.bf16.msra.mxu0 %v1499_v12 }
  0x8a   : > { %1047 = vmatprep.subr.bf16.mxu0 %v1286_v4 }
  0x8d   : > { %1049 = vmatpush3.bf16.msra.mxu0 %v1510_v16 }
  0x8e   : > { %1050 = vmatprep.subr.bf16.mxu0 %v1286_v4 }
  0x91   : > { %1052 = vmatpush3.bf16.msra.mxu0 %v1516_v19 }
  0x92   : > { %1053 = vmatprep.subr.bf16.mxu0 %v1286_v4 }
  0x95   : > { %1055 = vmatpush3.bf16.msra.mxu0 %v1522_v22 }
  0x96   : > { %1056 = vmatprep.subr.bf16.mxu0 %v1286_v4 }
  0x99   : > { %1058 = vmatpush3.bf16.msra.mxu0 %v1528_v25 }
  0x9a   : > { %1059 = vmatprep.subr.bf16.mxu0 %v1286_v4 }
  0x9d   : > { %1061 = vmatpush3.bf16.msra.mxu0 %v1534_v28 }
 0x153   : > { %v345_v32 = vpop.f32.mrb[0].mxu0 }
 0x154   : > { %v346_v34 = vadd.f32 %v345_v32, %v273_v30  ;;  %v884_v35 = vpop.f32.mrb[1].mxu0 }
 0x156   : > { %v349_v36 = vmul.f32 0.00105, %v346_v34 }
 0x158   : > { %v350_v38 = vadd.f32 %v349_v36, %v278_v33 }
 0x15a   : > { %v351_v42 = vmul.f32 0.042, %v350_v38  ;;  %361 = vst [vmem:[%s1478_s12 + $0x10] sm:$0xff] %v350_v38  ;;  %vm365_vm2 = vcmp.gt.f32.partialorder %v350_v38, 0.008 }
 0x15b   : > { %v756_v43 = vsel %vm365_vm2, 1.0, %v1288_v7  ;;  %v368_v44 = vsel %vm365_vm2, 0.0, %v350_v38 }
 0x15c   : > { %v352_v45 = vadd.f32 %v351_v42, %v271_v40  ;;  %760 = vst [vmem:[%s1478_s12 + $0x38] sm:$0xff] %v756_v43  ;;  %v369_v55 = vmul.f32 0.99895, %v368_v44 }
 0x15e   : > { %v354_v47 = vsub.f32 %v352_v45, %v353_v41 }
 0x160   : > { %v356_v48 = vsub.f32 %v354_v47, %v355_v46 }
 0x162   : > { %360 = vst [vmem:[%s1478_s12 + $0x8] sm:$0xff] %v356_v48  ;;  %v357_v49 = vmul.f32 0.042, %v356_v48  ;;  %v446_v0 = vmul.f32 %v1572_v39, %v356_v48 }
 0x164   : > { %v358_v50 = vadd.f32 %v357_v49, %v270_v29 }
 0x166   : > { %359 = vst [vmem:[%s1478_s12] sm:$0xff] %v358_v50  ;;  %918 = vmatmul.mubr.f32.vlgmr.msra.gmra.mrb[0].mxu1 %v358_v50  ;;  %v444_v61 = vmul.f32 %v1567_v37, %v358_v50 }
 0x167   : > { %1064 = vmatpush3.bf16.msra.mxu1 %v1483_v5  ;;  %987 = vmatprep.mubr.msk.f32.mxu1 %vm1287_vm0, %v1288_v7 }
 0x168   : > { %1065 = vmatprep.subr.bf16.mxu1 %v1286_v4 }
 0x16b   : > { %1067 = vmatpush3.bf16.msra.mxu1 %v1491_v8 }
 0x16c   : > { %1068 = vmatprep.subr.bf16.mxu1 %v1286_v4 }
 0x16f   : > { %1070 = vmatpush3.bf16.msra.mxu1 %v1499_v12 }
 0x170   : > { %1071 = vmatprep.subr.bf16.mxu1 %v1286_v4 }
 0x173   : > { %1073 = vmatpush3.bf16.msra.mxu1 %v1510_v16 }
 0x174   : > { %1074 = vmatprep.subr.bf16.mxu1 %v1286_v4 }
 0x177   : > { %1076 = vmatpush3.bf16.msra.mxu1 %v1516_v19 }
 0x178   : > { %1077 = vmatprep.subr.bf16.mxu1 %v1286_v4 }
 0x17b   : > { %1079 = vmatpush3.bf16.msra.mxu1 %v1522_v22  ;;  %v767_v22 = vld [vmem:[%s1467_s6 + $0x18] sm:$0xff] }
 0x17c   : > { %1080 = vmatprep.subr.bf16.mxu1 %v1286_v4 }
 0x17f   : > { %1082 = vmatpush3.bf16.msra.mxu1 %v1528_v25 }
 0x180   : > { %1083 = vmatprep.subr.bf16.mxu1 %v1286_v4  ;;  %v761_v4 = vld [vmem:[%s1467_s6 + $0x10] sm:$0xff] }
 0x183   : > { %1085 = vmatpush3.bf16.msra.mxu1 %v1534_v28 }
 0x239   : > { %v436_v52 = vpop.f32.mrb[0].mxu1 }
 0x23a   : > { %v437_v53 = vadd.f32 %v755_v51, %v436_v52  ;;  %v919_v54 = vpop.f32.mrb[1].mxu1 }
 0x23c   : > { %v440_v56 = vmul.f32 0.00105, %v437_v53 }
 0x23e   : > { %v441_v57 = vadd.f32 %v440_v56, %v369_v55 }
 0x240   : > { %v442_v58 = vmul.f32 0.042, %v441_v57  ;;  %759 = vst [vmem:[%s1478_s12 + $0x30] sm:$0xff] %v441_v57  ;;  %vm457_vm3 = vcmp.gt.f32.partialorder %v441_v57, 0.008 }
 0x241   : > { %v762_v59 = vsel %vm457_vm3, 1.0, %v1288_v7  ;;  %v460_v60 = vsel %vm457_vm3, 0.0, %v441_v57 }
 0x242   : > { %v443_v62 = vadd.f32 %v442_v58, %v356_v48  ;;  %766 = vst [vmem:[%s1478_s12 + $0x58] sm:$0xff] %v762_v59  ;;  %v461_v9 = vmul.f32 0.99895, %v460_v60 }
 0x244   : > { %v445_v63 = vsub.f32 %v443_v62, %v444_v61 }
 0x246   : > { %v447_v1 = vsub.f32 %v445_v63, %v446_v0 }
 0x248   : > { %758 = vst [vmem:[%s1478_s12 + $0x28] sm:$0xff] %v447_v1  ;;  %v448_v2 = vmul.f32 0.042, %v447_v1  ;;  %v538_v18 = vmul.f32 %v1572_v39, %v447_v1 }
 0x24a   : > { %v449_v3 = vadd.f32 %v448_v2, %v358_v50 }
 0x24c   : > { %757 = vst [vmem:[%s1478_s12 + $0x20] sm:$0xff] %v449_v3  ;;  %953 = vmatmul.mubr.f32.vlgmr.msra.gmra.mrb[2].mxu0 %v449_v3  ;;  %v536_v15 = vmul.f32 %v1567_v37, %v449_v3 }
 0x31f   : > { %v528_v5 = vpop.f32.mrb[2].mxu0 }
 0x320   : > { %v529_v6 = vadd.f32 %v761_v4, %v528_v5  ;;  %v954_v8 = vpop.f32.mrb[3].mxu0 }
 0x322   : > { %v532_v10 = vmul.f32 0.00105, %v529_v6 }
 0x324   : > { %v533_v11 = vadd.f32 %v532_v10, %v461_v9 }
 0x326   : > { %v534_v12 = vmul.f32 0.042, %v533_v11  ;;  %765 = vst [vmem:[%s1478_s12 + $0x50] sm:$0xff] %v533_v11  ;;  %vm549_vm4 = vcmp.gt.f32.partialorder %v533_v11, 0.008 }
 0x327   : > { %v768_v13 = vsel %vm549_vm4, 1.0, %v1288_v7  ;;  %v552_v14 = vsel %vm549_vm4, 0.0, %v533_v11 }
 0x328   : > { %v535_v16 = vadd.f32 %v534_v12, %v447_v1  ;;  %772 = vst [vmem:[%s1478_s12 + $0x78] sm:$0xff] %v768_v13  ;;  %v553_v25 = vmul.f32 0.99895, %v552_v14 }
 0x32a   : > { %v537_v17 = vsub.f32 %v535_v16, %v536_v15 }
 0x32c   : > { %v539_v19 = vsub.f32 %v537_v17, %v538_v18 }
 0x32e   : > { %764 = vst [vmem:[%s1478_s12 + $0x48] sm:$0xff] %v539_v19  ;;  %v540_v20 = vmul.f32 0.042, %v539_v19  ;;  %v630_v32 = vmul.f32 %v1572_v39, %v539_v19 }
 0x330   : > { %v541_v21 = vadd.f32 %v540_v20, %v449_v3 }
 0x332   : > { %763 = vst [vmem:[%s1478_s12 + $0x40] sm:$0xff] %v541_v21  ;;  %988 = vmatmul.mubr.f32.vlgmr.msra.gmra.mrb[2].mxu1 %v541_v21  ;;  %v628_v30 = vmul.f32 %v1567_v37, %v541_v21 }
 0x405   : > { %v620_v23 = vpop.f32.mrb[2].mxu1 }
 0x406   : > { %v621_v7 = vadd.f32 %v767_v22, %v620_v23  ;;  %v989_v24 = vpop.f32.mrb[3].mxu1 }
 0x408   : > { %v624_v26 = vmul.f32 0.00105, %v621_v7 }
 0x40a   : > { %v625_v27 = vadd.f32 %v624_v26, %v553_v25 }
 0x40c   : > { %v626_v28 = vmul.f32 0.042, %v625_v27  ;;  %771 = vst [vmem:[%s1478_s12 + $0x70] sm:$0xff] %v625_v27  ;;  %641 = vst [vmem:[#allocation4] sm:$0xff] %v625_v27 }
 0x40e   : > { %v627_v29 = vadd.f32 %v626_v28, %v539_v19 }
 0x410   : > { %v629_v31 = vsub.f32 %v627_v29, %v628_v30 }
 0x412   : > { %v631_v33 = vsub.f32 %v629_v31, %v630_v32 }
 0x414   : > { %v632_v34 = vmul.f32 0.042, %v631_v33  ;;  %770 = vst [vmem:[%s1478_s12 + $0x68] sm:$0xff] %v631_v33  ;;  %640 = vst [vmem:[#allocation3] sm:$0xff] %v631_v33 }
 0x416   : > { %v633_v35 = vadd.f32 %v632_v34, %v541_v21 }
 0x418   : > { %769 = vst [vmem:[%s1478_s12 + $0x60] sm:$0xff] %v633_v35  ;;  %639 = vst [vmem:[#allocation2] sm:$0xff] %v633_v35 }
 0x419   : > { %1222 = shalt.err (!%p1219_p10)
}
 0x41a   : > { %s1223_s6 = scalar_lea.hbm %s1624_s8, 2048  ;;  %s1227_s21 = scalar_lea.hbm %s1675_s4, 4096 }
 0x41b   : > { %p1224_p1 = scmp.ne.s32.totalorder %s1624_s8, %s1223_s6  ;;  %p1228_p12 = scmp.lt.u32.totalorder %s1624_s8, %s1675_s4 }
 0x41c   : > { %p1229_p2 = scmp.lt.u32.totalorder %s1227_s21, %s1223_s6  ;;  %p1231_p6 = scmp.lt.u32.totalorder %s1223_s6, %s1624_s8 }
 0x41d   : > { %p1225_p0 = pnand %p1224_p1, %p1412_p11 }
 0x41e   : > { %p1230_p4 = por %p1229_p2, %p1228_p12 }
 0x41f   : > { %p1226_p5 = pneg %p1225_p0 }
 0x420   : > { %p1232_p8 = por %p1231_p6, %p1230_p4 }
 0x422   : > { %p1233_p9 = pnand %p1232_p8, %p1226_p5 }
 0x424   : > { %1236 = shalt.err (!%p1233_p9)
}
 0x425   : > { %s1290_s28 = smov 512   ;;  %s1291_s29 = smov 32  }
 0x426   : > { %1092 = dma.vmem_to_hbm [thread:$0]  (%p1412_p11), %s1626_s10, 2048, %s1624_s8, %s643_s25, %s1290_s28, %s1290_s28, %s1291_s29  }
 0x427 PF: > { %s672_s7 = sand.u32 1, %s1267_s15   ;;  %p1691_p13 = scmp.ne.s32.totalorder %s1680_s22, 0 }
 0x428   : > { %p1692_p3 = scmp.ge.s32.totalorder %s1279_s18, 2  ;;  %s673_s26 = scalar_lea.sflag [#allocation7], %s672_s7 }
 0x42a   : > { %p1103_p7 = pnand %p1692_p3, %p1691_p13 }
 0x42c   : > { %1262 = dma.done.wait (!%p1103_p7), %s673_s26, 2048  }
 0x42d   : > { %1264 = vsyncadd (!%p1103_p7), %s673_s26, 4294965248  ;;  %p18_p10 = scmp.ge.s32.totalorder %s1374_s27, 4   ;;  %s1693_s15 = smov %s1271_s16 }
 0x42e   : > { %s1694_s16 = smov %s1275_s17  ;;  %s1695_s17 = smov %s1408_s24 }
 0x42f   : > { %s1696_s18 = smov %s1374_s27  ;;  %20 = sbr.rel (!%p18_p10) target bundleno = 6 (0x6), region = 95 }
 0x436   :  { %678 = vsyncpa [#allocation6], 1 }
 0x437   :  { %680 = vsyncpa [#allocation6 + $0x1], 1 }
 0x438   :  { %681 = vsyncpa [#allocation9], 1 }
 0x439   :  { %682 = vsyncpa [#allocation7], 1 }
 0x43a   :  { %684 = vsyncpa [#allocation7 + $0x1], 1 }

</bundles_post_ra>
